<compile_context>
chip_gen: v6e
topology: v6e:2x2x1
jax: 0.10.0
libtpu: 0.0.40
codegen_flags: <defaults>
</compile_context>

<pallas_src>
import jax
import jax.numpy as jnp
from jax import lax
from jax.experimental import pallas as pl
from jax.experimental.pallas import tpu as pltpu


def mlp_kernel(x_ref, w1_ref, b1_ref, w2_ref, b2_ref, o_ref):
    # x_ref : (TB, D_in) f32, natural layout (no wrapper transpose)
    # w1_ref: (H, D_in)  f32, lin1.weight (PyTorch layout)
    # b1_ref: (H, 1)     f32
    # w2_ref: (H, 1)     f32, lin2.weight.T
    # b2_ref: (1, 1)     f32, SMEM scalar
    # o_ref : (1, TB)    f32, lane-dense output tile
    #
    # Contract D_in of both operands: (H, D_in) x (TB, D_in) -> (H, TB).
    # Batch lands on the lane axis without any HBM-side transpose.
    h = lax.dot_general(
        w1_ref[...], x_ref[...],
        dimension_numbers=(((1,), (1,)), ((), ())),
        preferred_element_type=jnp.float32,
    )                                                                  # MXU
    h = jnp.maximum(h + b1_ref[...], 0.0)                              # bias + ReLU (VPU)
    # lin2 (out_features == 1): lane-wise multiply + cross-sublane reduce
    # instead of a degenerate MXU matmul.
    z = jnp.sum(h * w2_ref[...], axis=0, keepdims=True) + b2_ref[0, 0]  # (1, TB)
    o_ref[...] = jax.nn.sigmoid(z).astype(o_ref.dtype)                  # EUP


def _round_up(n, m):
    return ((n + m - 1) // m) * m


def neural_net_forward(x, w1, b1, w2, b2, *, tb=1024):
    """out = sigmoid(relu(x @ w1.T + b1) @ w2.T + b2)   (PyTorch Linear semantics)

    x : (B, D_in) f32
    w1: (H, D_in) f32   (== lin1.weight)
    b1: (H,)      f32   (== lin1.bias)
    w2: (1, H)    f32   (== lin2.weight)
    b2: (1,)      f32   (== lin2.bias)
    returns (B, 1) f32
    """
    B, d_in = x.shape
    H = w1.shape[0]

    # Tile selection: biggest tile that fits B (grid=1 for small B on v5e/v6e),
    # but for large B keep at least two (even) grid steps so v7x's 2 TCs both
    # get work.  Always a multiple of 128 (lane width) unless tb == B.
    tb = min(tb, B)
    if B > 2 * 128:
        tb = min(tb, _round_up(pl.cdiv(B, 2), 128))

    b1c = b1.reshape(H, 1)
    w2c = w2.reshape(H, 1)         # lin2.weight.T as a column
    b2s = b2.reshape(1, 1)

    out = pl.pallas_call(
        mlp_kernel,
        out_shape=jax.ShapeDtypeStruct((1, B), jnp.float32),
        grid=(pl.cdiv(B, tb),),
        in_specs=[
            # batch-tiled input in natural (B, D_in) layout, pipelined across steps
            pl.BlockSpec((tb, d_in), lambda i: (i, 0)),
            # weights / bias pinned VMEM-resident (constant block index)
            pl.BlockSpec((H, d_in), lambda i: (0, 0)),
            pl.BlockSpec((H, 1), lambda i: (0, 0)),
            pl.BlockSpec((H, 1), lambda i: (0, 0)),
            # scalar bias lives in SMEM (no padded VMEM tile, no per-step DMA)
            pl.BlockSpec(memory_space=pltpu.MemorySpace.SMEM),
        ],
        out_specs=pl.BlockSpec((1, tb), lambda i: (0, i)),
        compiler_params=pltpu.CompilerParams(
            # batch axis is independent -> shard across TCs on v7x (no-op on v5e/v6e)
            dimension_semantics=("parallel",),
        ),
    )(x, w1, b1c, w2c, b2s)

    # (1, B) lane-dense kernel output -> (B, 1) module output
    return out.reshape(B, 1)


def init_params(key, input_dim, hidden_dim):
    # Deterministic PyTorch-like uniform(-1/sqrt(fan_in), 1/sqrt(fan_in)) init,
    # stored in native PyTorch Linear layout (out_features, in_features).
    k1, k2, k3, k4 = jax.random.split(key, 4)
    bound1 = 1.0 / jnp.sqrt(input_dim)
    bound2 = 1.0 / jnp.sqrt(hidden_dim)
    w1 = jax.random.uniform(k1, (hidden_dim, input_dim), jnp.float32, -bound1, bound1)
    b1 = jax.random.uniform(k2, (hidden_dim,), jnp.float32, -bound1, bound1)
    w2 = jax.random.uniform(k3, (1, hidden_dim), jnp.float32, -bound2, bound2)
    b2 = jax.random.uniform(k4, (1,), jnp.float32, -bound2, bound2)
    return w1, b1, w2, b2


if __name__ == "__main__":
    key = jax.random.PRNGKey(0)
    k_x, k_p = jax.random.split(key)

    # Small shapes consistent with the module; batch chosen large enough that
    # the v7x tile cap kicks in and the grid has 2 (even) pipelined steps.
    batch, input_dim, hidden_dim = 512, 16, 32
    x = jax.random.normal(k_x, (batch, input_dim), jnp.float32)
    w1, b1, w2, b2 = init_params(k_p, input_dim, hidden_dim)

    out = neural_net_forward(x, w1, b1, w2, b2)
    out = jax.block_until_ready(out)

    # Reference check (plain JAX, PyTorch Linear semantics)
    ref = jax.nn.sigmoid(jnp.maximum(x @ w1.T + b1, 0.0) @ w2.T + b2)
    assert out.shape == (batch, 1)
    assert jnp.allclose(out, ref, atol=1e-5), "mismatch vs reference"

    print("KERNEL_OK")
</pallas_src>

<mosaic_0001>
module attributes {stable_mosaic.version = 11 : i64} {
  func.func @mlp_kernel(%arg0: i32, %arg1: memref<256x16xf32, #tpu.memory_space<vmem>>, %arg2: memref<32x16xf32, #tpu.memory_space<vmem>>, %arg3: memref<32x1xf32, #tpu.memory_space<vmem>>, %arg4: memref<32x1xf32, #tpu.memory_space<vmem>>, %arg5: memref<1x1xf32, #tpu.memory_space<smem>>, %arg6: memref<1x256xf32, #tpu.memory_space<vmem>>) attributes {dimension_semantics = [#tpu.dimension_semantics<parallel>], iteration_bounds = array<i64: 2>, scalar_prefetch = 0 : i64, scratch_operands = 0 : i64, tpu.core_type = #tpu.core_type<tc>, window_params = [{transform_indices = @transform_0, window_bounds = array<i64: 256, 16>}, {pipeline_mode = #tpu.pipeline_mode<synchronous>, transform_indices = @transform_1, window_bounds = array<i64: 32, 16>}, {pipeline_mode = #tpu.pipeline_mode<synchronous>, transform_indices = @transform_2, window_bounds = array<i64: 32, 1>}, {pipeline_mode = #tpu.pipeline_mode<synchronous>, transform_indices = @transform_3, window_bounds = array<i64: 32, 1>}, {transform_indices = @transform_4, window_bounds = array<i64: 1, 1>}, {transform_indices = @transform_5, window_bounds = array<i64: 1, 256>}]} {
    %c0 = arith.constant 0 : index
    %c0_0 = arith.constant 0 : index
    %0 = vector.load %arg2[%c0, %c0_0] : memref<32x16xf32, #tpu.memory_space<vmem>>, vector<32x16xf32>
    %c0_1 = arith.constant 0 : index
    %c0_2 = arith.constant 0 : index
    %1 = vector.load %arg1[%c0_1, %c0_2] : memref<256x16xf32, #tpu.memory_space<vmem>>, vector<256x16xf32>
    %cst = arith.constant dense<0.000000e+00> : vector<32x256xf32>
    %2 = tpu.matmul %0, %1, %cst {dimension_numbers = #tpu.dot_dimension_numbers<[1], [1], [0], [0], [0, 0, 1, 0], [], []>} : vector<32x16xf32>, vector<256x16xf32>, vector<32x256xf32> -> vector<32x256xf32>
    %c0_3 = arith.constant 0 : index
    %c0_4 = arith.constant 0 : index
    %3 = vector.load %arg3[%c0_3, %c0_4] : memref<32x1xf32, #tpu.memory_space<vmem>>, vector<32x1xf32>
    %4 = vector.broadcast %3 : vector<32x1xf32> to vector<32x256xf32>
    %5 = arith.addf %2, %4 : vector<32x256xf32>
    %cst_5 = arith.constant 0.000000e+00 : f32
    %6 = vector.broadcast %cst_5 : f32 to vector<32x256xf32>
    %7 = arith.maximumf %5, %6 : vector<32x256xf32>
    %c0_6 = arith.constant 0 : index
    %c0_7 = arith.constant 0 : index
    %8 = vector.load %arg4[%c0_6, %c0_7] : memref<32x1xf32, #tpu.memory_space<vmem>>, vector<32x1xf32>
    %9 = vector.broadcast %8 : vector<32x1xf32> to vector<32x256xf32>
    %10 = arith.mulf %7, %9 : vector<32x256xf32>
    %cst_8 = arith.constant dense<0.000000e+00> : vector<256xf32>
    %11 = vector.multi_reduction <add>, %10, %cst_8 [0] : vector<32x256xf32> to vector<256xf32>
    %12 = vector.shape_cast %11 : vector<256xf32> to vector<1x256xf32>
    %c0_9 = arith.constant 0 : index
    %c0_10 = arith.constant 0 : index
    %13 = memref.load %arg5[%c0_9, %c0_10] : memref<1x1xf32, #tpu.memory_space<smem>>
    %14 = vector.broadcast %13 : f32 to vector<1x256xf32>
    %15 = arith.addf %12, %14 : vector<1x256xf32>
    %16 = arith.negf %15 : vector<1x256xf32>
    %17 = math.exp %16 : vector<1x256xf32>
    %cst_11 = arith.constant 1.000000e+00 : f32
    %18 = vector.broadcast %cst_11 : f32 to vector<1x256xf32>
    %19 = arith.addf %18, %17 : vector<1x256xf32>
    %20 = arith.divf %18, %19 : vector<1x256xf32>
    %c0_12 = arith.constant 0 : index
    %c0_13 = arith.constant 0 : index
    %21 = vector.load %arg6[%c0_12, %c0_13] : memref<1x256xf32, #tpu.memory_space<vmem>>, vector<1x256xf32>
    tpu.vector_store %arg6[%c0_12, %c0_13], %20 {strides = array<i32>} : memref<1x256xf32, #tpu.memory_space<vmem>>, vector<1x256xf32>,
    return
  }
  func.func @transform_0(%arg0: i32) -> (i32, i32) {
    %c0_i32 = arith.constant 0 : i32
    %c0_i32_0 = arith.constant 0 : i32
    return %arg0, %c0_i32 : i32, i32
  }
  func.func @transform_1(%arg0: i32) -> (i32, i32) {
    %c0_i32 = arith.constant 0 : i32
    %c0_i32_0 = arith.constant 0 : i32
    %c0_i32_1 = arith.constant 0 : i32
    return %c0_i32, %c0_i32_0 : i32, i32
  }
  func.func @transform_2(%arg0: i32) -> (i32, i32) {
    %c0_i32 = arith.constant 0 : i32
    %c0_i32_0 = arith.constant 0 : i32
    %c0_i32_1 = arith.constant 0 : i32
    return %c0_i32, %c0_i32_0 : i32, i32
  }
  func.func @transform_3(%arg0: i32) -> (i32, i32) {
    %c0_i32 = arith.constant 0 : i32
    %c0_i32_0 = arith.constant 0 : i32
    %c0_i32_1 = arith.constant 0 : i32
    return %c0_i32, %c0_i32_0 : i32, i32
  }
  func.func @transform_4(%arg0: i32) -> (i32, i32) {
    %c0_i32 = arith.constant 0 : i32
    %c0_i32_0 = arith.constant 0 : i32
    %c0_i32_1 = arith.constant 0 : i32
    return %c0_i32, %c0_i32_0 : i32, i32
  }
  func.func @transform_5(%arg0: i32) -> (i32, i32) {
    %c0_i32 = arith.constant 0 : i32
    %c0_i32_0 = arith.constant 0 : i32
    return %c0_i32, %arg0 : i32, i32
  }
}

</mosaic_0001>

<bundles_post_ra>
// kernel: tpu_custom_call.1
= control target key start
LH: loop header
LB: loop body
LE: loop exit
PB: predicated region body
PF: predicated region fallthrough
CT: control target
= control target key end

     0   :  { %s1164_s0 = inlined_call_operand.vmem [shape: f32[512,16], index: 0, kind: input, shape index: {}]   ;;  %s1165_s1 = inlined_call_operand.vmem [shape: f32[32,16], index: 1, kind: input, shape index: {}]   ;;  %s1166_s2 = inlined_call_operand.vmem [shape: f32[32,1], index: 2, kind: input, shape index: {}]   ;;  %s1167_s3 = inlined_call_operand.vmem [shape: f32[32,1], index: 3, kind: input, shape index: {}]   ;;  %s1168_s4 = inlined_call_operand.<no memory space> [shape: f32[1,1], index: 4, kind: input, shape index: {}]   ;;  %s1169_s5 = inlined_call_operand.hbm [shape: f32[1,512], index: 5, kind: output, shape index: {}]  }
   0x1   :  { %10 = sst [smem:[#allocation2]] %s1168_s4 }
   0x2   :  { %11 = vsyncpa [#allocation4], 0 }
   0x3   :  { %13 = vsyncpa [#allocation4 + $0x1], 0  ;;  %s928_s20 = smov 0   ;;  %s930_s21 = smov 0  }
   0x4   :  { %s932_s22 = smov 0   ;;  %s934_s23 = smov 0  }
   0x5 LB: > { %s655_s4 = sadd.s32 4294967295, %s890_s23   ;;  %s656_s24 = sadd.s32 4294967294, %s890_s23   ;;  %s890_s23 = sphi %s934_s23, %s1175_s23   ;;  %s886_s22 = sphi %s932_s22, %s1174_s22   ;;  %s882_s21 = sphi %s930_s21, %s1173_s21   ;;  %s878_s20 = sphi %s928_s20, %s1172_s20  }
   0x6   : > { %s951_s25 = sadd.s32 1, %s890_s23   ;;  %s136_s26 = sadd.s32 1, %s886_s22 }
   0x7   : > { %s133_s27 = ssub.s32 %s890_s23, %s951_s25  ;;  %p146_p0 = scmp.ne.s32.totalorder %s886_s22, %s882_s21 }
   0x8   : > { %p134_p1 = scmp.eq.s32.totalorder %s133_s27, 0  ;;  %p147_p2 = scmp.eq.s32.totalorder %s655_s4, 1 }
   0x9   : > { %p152_p3 = scmp.ne.s32.totalorder %s882_s21, %s878_s20  ;;  %p153_p4 = scmp.eq.s32.totalorder %s656_s24, 1 }
   0xa   : > { %s961_s28 = scalar_select %p134_p1, %s886_s22, %s136_s26  }
   0xb   : > { %p963_p5 = por %p147_p2, %p146_p0  ;;  %p967_p6 = por %p153_p4, %p152_p3 }
   0xc   : > { %p659_p7 = scmp.ge.s32.totalorder %s890_s23, 1  ;;  %p192_p8 = scmp.lt.s32.totalorder %s890_s23, 3 }
   0xe   : > { %p193_p9 = pnand %p659_p7, %p192_p8 }
   0xf   : > { %s973_s6 = sshll.u32 (!%p193_p9), %s655_s4, 5  ;;  %s543_s19 = sld [smem:[#allocation2]] (!%p193_p9) }
  0x10   : > { %196 = sbr.rel (%p193_p9) target bundleno = 366 (0x16e), region = 40  ;;  %p221_p10 = scmp.lt.s32.totalorder (!%p193_p9), %s973_s6, 63 }
  0x11   : > { %s595_s9 = scalar_lea.hbm (!%p193_p9), %s1169_s5, %s973_s6  ;;  %s894_s12 = smov (!%p193_p9), [#allocation3]  }
  0x12   : > { %s834_s13 = sshll.u32 (!%p193_p9), %s894_s12, 4  ;;  %s835_s13 = int_to_ptr.vmem [resolvable:$false] %s834_s13 }
  0x13   : > { %s836_s14 = scalar_lea.vmem (!%p193_p9), %s835_s13, 64 }
  0x15   : > { %vm287_vm0 = vcmask 130048   ;;  %v978_v0 = vld [vmem:[%s1165_s1] sm:$0xff]  ;;  %v983_v1 = vld [vmem:[%s1165_s1 + $0x10] sm:$0xff]  ;;  %v892_v4 = vmov 0   ;;  %s222_s15 = scalar_select %p221_p10, %s973_s6, 63  ;;  %v264_v5 = vld [vmem:[%s1166_s2 + $0x8] sm:$0xff] }
  0x16   : > { %739 = vmatprep.mubr.msk.f32.mxu0 %vm287_vm0, %v978_v0  ;;  %743 = vmatprep.mubr.msk.f32.mxu1 %vm287_vm0, %v983_v1  ;;  %v263_v2 = vld [vmem:[%s1166_s2] sm:$0xff]  ;;  %v265_v3 = vld [vmem:[%s1166_s2 + $0x10] sm:$0xff]  ;;  %v266_v6 = vld [vmem:[%s1166_s2 + $0x18] sm:$0xff] }
  0x17   : > { %820 = vset.pattern.permute.xlu0 %v892_v4  ;;  %821 = vset.pattern.permute.xlu1 %v892_v4  ;;  %s662_s4 = sshll.u32 %s222_s15, 3  ;;  %v493_v10 = vld [vmem:[%s1167_s3] sm:$0xff]  ;;  %v494_v11 = vld [vmem:[%s1167_s3 + $0x8] sm:$0xff]  ;;  %v495_v14 = vld [vmem:[%s1167_s3 + $0x10] sm:$0xff] }
  0x18   : > { %269 = vperm.xlu0 %820, %v263_v2   ;;  %279 = vperm.xlu1 %821, %v265_v3   ;;  %s1006_s27 = scalar_lea.vmem %s1164_s0, %s662_s4  ;;  %v496_v15 = vld [vmem:[%s1167_s3 + $0x18] sm:$0xff]  ;;  %v228_v43 = vld [vmem:[%s1165_s1 + $0x8] sm:$0xff]  ;;  %s217_s4 = sand.u32 1, %s882_s21  }
  0x19   : > { %v262_v7 = vld [vmem:[%s1006_s27 + $0xf8] sm:$0xff]  ;;  %v261_v9 = vld [vmem:[%s1006_s27 + $0xf0] sm:$0xff]  ;;  %v260_v13 = vld [vmem:[%s1006_s27 + $0xe8] sm:$0xff]  ;;  %s660_s24 = sshll.u32 %s217_s4, 1  ;;  %s583_s10 = scalar_lea.sflag [#allocation4], %s217_s4 }
  0x1a   : > { %v246_v8 = vld [vmem:[%s1006_s27 + $0x78] sm:$0xff]  ;;  %707 = vmatprep.subr.msk.mxu0 %vm287_vm0, %v262_v7  ;;  %747 = vmatprep.subr.msk.mxu1 %vm287_vm0, %v262_v7  ;;  %v245_v12 = vld [vmem:[%s1006_s27 + $0x70] sm:$0xff]  ;;  %v244_v16 = vld [vmem:[%s1006_s27 + $0x68] sm:$0xff]  ;;  %s219_s26 = scalar_lea.vmem [#allocation3], %s660_s24 }
  0x1b   : > { %708 = vmatpush3.xpose.msk.msra.mxu0 %vm287_vm0, %v246_v8  ;;  %763 = vmatpush3.xpose.msk.msra.mxu1 %vm287_vm0, %v246_v8  ;;  %v259_v17 = vld [vmem:[%s1006_s27 + $0xe0] sm:$0xff]  ;;  %v258_v19 = vld [vmem:[%s1006_s27 + $0xd8] sm:$0xff]  ;;  %v257_v21 = vld [vmem:[%s1006_s27 + $0xd0] sm:$0xff] }
  0x1c   : > { %274 = vperm.xlu0 %820, %v264_v5   ;;  %284 = vperm.xlu1 %821, %v266_v6   ;;  %v243_v18 = vld [vmem:[%s1006_s27 + $0x60] sm:$0xff]  ;;  %v242_v20 = vld [vmem:[%s1006_s27 + $0x58] sm:$0xff]  ;;  %v241_v22 = vld [vmem:[%s1006_s27 + $0x50] sm:$0xff] }
  0x1d   : > { %709 = vmatprep.subr.msk.mxu0 %vm287_vm0, %v261_v9  ;;  %748 = vmatprep.subr.msk.mxu1 %vm287_vm0, %v261_v9  ;;  %v256_v23 = vld [vmem:[%s1006_s27 + $0xc8] sm:$0xff]  ;;  %v255_v25 = vld [vmem:[%s1006_s27 + $0xc0] sm:$0xff]  ;;  %v254_v27 = vld [vmem:[%s1006_s27 + $0xb8] sm:$0xff] }
  0x1e   : > { %v240_v24 = vld [vmem:[%s1006_s27 + $0x48] sm:$0xff]  ;;  %v239_v26 = vld [vmem:[%s1006_s27 + $0x40] sm:$0xff]  ;;  %v238_v28 = vld [vmem:[%s1006_s27 + $0x38] sm:$0xff] }
  0x1f   : > { %710 = vmatpush3.xpose.msk.msra.mxu0 %vm287_vm0, %v245_v12  ;;  %764 = vmatpush3.xpose.msk.msra.mxu1 %vm287_vm0, %v245_v12  ;;  %v253_v29 = vld [vmem:[%s1006_s27 + $0xb0] sm:$0xff]  ;;  %v252_v31 = vld [vmem:[%s1006_s27 + $0xa8] sm:$0xff]  ;;  %v251_v33 = vld [vmem:[%s1006_s27 + $0xa0] sm:$0xff] }
  0x20   : > { %499 = vperm.xlu0 %820, %v493_v10   ;;  %504 = vperm.xlu1 %821, %v494_v11   ;;  %v237_v30 = vld [vmem:[%s1006_s27 + $0x30] sm:$0xff]  ;;  %v236_v32 = vld [vmem:[%s1006_s27 + $0x28] sm:$0xff]  ;;  %v235_v34 = vld [vmem:[%s1006_s27 + $0x20] sm:$0xff] }
  0x21   : > { %711 = vmatprep.subr.msk.mxu0 %vm287_vm0, %v260_v13  ;;  %749 = vmatprep.subr.msk.mxu1 %vm287_vm0, %v260_v13  ;;  %v250_v35 = vld [vmem:[%s1006_s27 + $0x98] sm:$0xff]  ;;  %v249_v37 = vld [vmem:[%s1006_s27 + $0x90] sm:$0xff]  ;;  %v248_v39 = vld [vmem:[%s1006_s27 + $0x88] sm:$0xff] }
  0x22   : > { %v234_v36 = vld [vmem:[%s1006_s27 + $0x18] sm:$0xff]  ;;  %v233_v38 = vld [vmem:[%s1006_s27 + $0x10] sm:$0xff]  ;;  %v232_v40 = vld [vmem:[%s1006_s27 + $0x8] sm:$0xff] }
  0x23   : > { %712 = vmatpush3.xpose.msk.msra.mxu0 %vm287_vm0, %v244_v16  ;;  %765 = vmatpush3.xpose.msk.msra.mxu1 %vm287_vm0, %v244_v16  ;;  %v247_v41 = vld [vmem:[%s1006_s27 + $0x80] sm:$0xff]  ;;  %v230_v44 = vld [vmem:[%s1165_s1 + $0x18] sm:$0xff] }
  0x24   : > { %509 = vperm.xlu0 %820, %v495_v14   ;;  %514 = vperm.xlu1 %821, %v496_v15   ;;  %v231_v42 = vld [vmem:[%s1006_s27] sm:$0xff]  ;;  %s597_s27 = sshll.u32 %s219_s26, 4  ;;  %s598_s27 = int_to_ptr.vmem [resolvable:$true] %s597_s27 }
  0x25   : > { %713 = vmatprep.subr.msk.mxu0 %vm287_vm0, %v259_v17  ;;  %750 = vmatprep.subr.msk.mxu1 %vm287_vm0, %v259_v17  ;;  %s830_s11 = scalar_lea.vmem %s598_s27, 32  ;;  %p837_p0 = scmp.lt.s32.totalorder %s598_s27, %s835_s13 }
  0x26   : > { %p831_p11 = scmp.ne.s32.totalorder %s598_s27, %s830_s11  ;;  %p838_p1 = scmp.lt.s32.totalorder %s836_s14, %s830_s11 }
  0x27   : > { %714 = vmatpush3.xpose.msk.msra.mxu0 %vm287_vm0, %v243_v18  ;;  %766 = vmatpush3.xpose.msk.msra.mxu1 %vm287_vm0, %v243_v18 }
  0x28   : > { %715 = vmatprep.subr.msk.mxu0 %vm287_vm0, %v258_v19  ;;  %751 = vmatprep.subr.msk.mxu1 %vm287_vm0, %v258_v19  ;;  %p832_p12 = pnand %p831_p11, %p963_p5  ;;  %p839_p2 = por %p838_p1, %p837_p0 }
  0x2a   : > { %p833_p13 = pneg %p832_p12 }
  0x2b   : > { %716 = vmatpush3.xpose.msk.msra.mxu0 %vm287_vm0, %v242_v20  ;;  %767 = vmatpush3.xpose.msk.msra.mxu1 %vm287_vm0, %v242_v20 }
  0x2c   : > { %717 = vmatprep.subr.msk.mxu0 %vm287_vm0, %v257_v21  ;;  %752 = vmatprep.subr.msk.mxu1 %vm287_vm0, %v257_v21  ;;  %p840_p3 = pnand %p839_p2, %p833_p13 }
  0x2f   : > { %718 = vmatpush3.xpose.msk.msra.mxu0 %vm287_vm0, %v241_v22  ;;  %768 = vmatpush3.xpose.msk.msra.mxu1 %vm287_vm0, %v241_v22 }
  0x30   : > { %719 = vmatprep.subr.msk.mxu0 %vm287_vm0, %v256_v23  ;;  %753 = vmatprep.subr.msk.mxu1 %vm287_vm0, %v256_v23 }
  0x33   : > { %720 = vmatpush3.xpose.msk.msra.mxu0 %vm287_vm0, %v240_v24  ;;  %769 = vmatpush3.xpose.msk.msra.mxu1 %vm287_vm0, %v240_v24 }
  0x34   : > { %721 = vmatprep.subr.msk.mxu0 %vm287_vm0, %v255_v25  ;;  %754 = vmatprep.subr.msk.mxu1 %vm287_vm0, %v255_v25 }
  0x37   : > { %722 = vmatpush3.xpose.msk.msra.mxu0 %vm287_vm0, %v239_v26  ;;  %770 = vmatpush3.xpose.msk.msra.mxu1 %vm287_vm0, %v239_v26 }
  0x38   : > { %723 = vmatprep.subr.msk.mxu0 %vm287_vm0, %v254_v27  ;;  %755 = vmatprep.subr.msk.mxu1 %vm287_vm0, %v254_v27 }
  0x3b   : > { %724 = vmatpush3.xpose.msk.msra.mxu0 %vm287_vm0, %v238_v28  ;;  %771 = vmatpush3.xpose.msk.msra.mxu1 %vm287_vm0, %v238_v28 }
  0x3c   : > { %725 = vmatprep.subr.msk.mxu0 %vm287_vm0, %v253_v29  ;;  %756 = vmatprep.subr.msk.mxu1 %vm287_vm0, %v253_v29 }
  0x3f   : > { %726 = vmatpush3.xpose.msk.msra.mxu0 %vm287_vm0, %v237_v30  ;;  %772 = vmatpush3.xpose.msk.msra.mxu1 %vm287_vm0, %v237_v30 }
  0x40   : > { %727 = vmatprep.subr.msk.mxu0 %vm287_vm0, %v252_v31  ;;  %757 = vmatprep.subr.msk.mxu1 %vm287_vm0, %v252_v31 }
  0x43   : > { %728 = vmatpush3.xpose.msk.msra.mxu0 %vm287_vm0, %v236_v32  ;;  %773 = vmatpush3.xpose.msk.msra.mxu1 %vm287_vm0, %v236_v32 }
  0x44   : > { %729 = vmatprep.subr.msk.mxu0 %vm287_vm0, %v251_v33  ;;  %758 = vmatprep.subr.msk.mxu1 %vm287_vm0, %v251_v33 }
  0x47   : > { %730 = vmatpush3.xpose.msk.msra.mxu0 %vm287_vm0, %v235_v34  ;;  %774 = vmatpush3.xpose.msk.msra.mxu1 %vm287_vm0, %v235_v34 }
  0x48   : > { %731 = vmatprep.subr.msk.mxu0 %vm287_vm0, %v250_v35  ;;  %759 = vmatprep.subr.msk.mxu1 %vm287_vm0, %v250_v35 }
  0x4b   : > { %732 = vmatpush3.xpose.msk.msra.mxu0 %vm287_vm0, %v234_v36  ;;  %775 = vmatpush3.xpose.msk.msra.mxu1 %vm287_vm0, %v234_v36  ;;  %v544_v36 = vstv %s543_s19 }
  0x4c   : > { %733 = vmatprep.subr.msk.mxu0 %vm287_vm0, %v249_v37  ;;  %760 = vmatprep.subr.msk.mxu1 %vm287_vm0, %v249_v37 }
  0x4f   : > { %734 = vmatpush3.xpose.msk.msra.mxu0 %vm287_vm0, %v233_v38  ;;  %776 = vmatpush3.xpose.msk.msra.mxu1 %vm287_vm0, %v233_v38 }
  0x50   : > { %735 = vmatprep.subr.msk.mxu0 %vm287_vm0, %v248_v39  ;;  %761 = vmatprep.subr.msk.mxu1 %vm287_vm0, %v248_v39 }
  0x53   : > { %736 = vmatpush3.xpose.msk.msra.mxu0 %vm287_vm0, %v232_v40  ;;  %777 = vmatpush3.xpose.msk.msra.mxu1 %vm287_vm0, %v232_v40 }
  0x54   : > { %737 = vmatprep.subr.msk.mxu0 %vm287_vm0, %v247_v41  ;;  %762 = vmatprep.subr.msk.mxu1 %vm287_vm0, %v247_v41 }
  0x57   : > { %738 = vmatpush3.xpose.msk.msra.mxu0 %vm287_vm0, %v231_v42  ;;  %778 = vmatpush3.xpose.msk.msra.mxu1 %vm287_vm0, %v231_v42 }
  0x5a   : > { %740 = vmatmul.mubr.msk.f32.vlgmr.msra.gmra.mxu0 %vm287_vm0, %v978_v0  ;;  %744 = vmatmul.mubr.msk.f32.vlgmr.msra.gmra.mxu1 %vm287_vm0, %v983_v1 }
  0x5b   : > { %741 = vmatprep.mubr.msk.f32.mxu0 %vm287_vm0, %v228_v43  ;;  %745 = vmatprep.mubr.msk.f32.mxu1 %vm287_vm0, %v230_v44 }
  0x5e   : > { %742 = vmatmul.mubr.msk.f32.gmra.mxu0 %vm287_vm0, %v228_v43  ;;  %746 = vmatmul.mubr.msk.f32.gmra.mxu1 %vm287_vm0, %v230_v44 }
  0x93   : > { %v270_v45 = vpop.permute.xlu0 %269  ;;  %v280_v46 = vpop.permute.xlu1 %279 }
  0x97   : > { %v275_v47 = vpop.permute.xlu0 %274  ;;  %v285_v50 = vpop.permute.xlu1 %284 }
  0x9b   : > { %v500_v58 = vpop.permute.xlu0 %499  ;;  %v505_v1 = vpop.permute.xlu1 %504 }
  0x9f   : > { %v510_v12 = vpop.permute.xlu0 %509  ;;  %v515_v18 = vpop.permute.xlu1 %514 }
 0x11a   : > { %v462_v48 = vpop.f32.mrf.mxu0  ;;  %v474_v49 = vpop.f32.mrf.mxu1 }
 0x11b   : > { %v463_v51 = vadd.f32 %v462_v48, %v270_v45  ;;  %v475_v55 = vadd.f32 %v474_v49, %v280_v46  ;;  %v893_v48 = vmov 1966171168  }
 0x11c   : > { %v464_v52 = vpop.f32.mrf.mxu0  ;;  %v476_v53 = vpop.f32.mrf.mxu1  ;;  %v563_v49 = vunpack.c.l.s4 %v893_v48 }
 0x11d   : > { %v465_v54 = vadd.f32 %v464_v52, %v270_v45  ;;  %v477_v59 = vadd.f32 %v476_v53, %v280_v46  ;;  %v485_v60 = vmax.f32 %v463_v51, 0.0  ;;  %v489_v5 = vmax.f32 %v475_v55, 0.0 }
 0x11e   : > { %v468_v56 = vpop.f32.mrf.mxu0  ;;  %v480_v57 = vpop.f32.mrf.mxu1  ;;  %v564_v51 = vunpack.c.0.s8 %v563_v49 }
 0x11f   : > { %v469_v61 = vadd.f32 %v468_v56, %v275_v47  ;;  %v481_v62 = vadd.f32 %v480_v57, %v285_v50  ;;  %v486_v2 = vmax.f32 %v465_v54, 0.0  ;;  %v490_v7 = vmax.f32 %v477_v59, 0.0 }
 0x120   : > { %v470_v63 = vpop.f32.mrf.mxu0  ;;  %v482_v0 = vpop.f32.mrf.mxu1  ;;  %v517_v9 = vmul.f32 %v500_v58, %v485_v60  ;;  %v521_v16 = vmul.f32 %v510_v12, %v489_v5 }
 0x121   : > { %v471_v3 = vadd.f32 %v470_v63, %v275_v47  ;;  %v483_v4 = vadd.f32 %v482_v0, %v285_v50  ;;  %v487_v6 = vmax.f32 %v469_v61, 0.0  ;;  %v491_v11 = vmax.f32 %v481_v62, 0.0 }
 0x122   : > { %v518_v13 = vmul.f32 %v500_v58, %v486_v2  ;;  %v522_v19 = vmul.f32 %v510_v12, %v490_v7  ;;  %v565_v50 = vlaneseq }
 0x123   : > { %v488_v8 = vmax.f32 %v471_v3, 0.0  ;;  %v519_v10 = vmul.f32 %v505_v1, %v487_v6  ;;  %v492_v15 = vmax.f32 %v483_v4, 0.0  ;;  %v523_v21 = vmul.f32 %v515_v18, %v491_v11 }
 0x124   : > { %v566_v52 = vshrl.u32 %v565_v50, 7  ;;  %vm579_vm1 = vcmp.lt.s32.totalorder %v565_v50, 256 }
 0x125   : > { %v520_v14 = vmul.f32 %v505_v1, %v488_v8  ;;  %v525_v17 = vadd.f32 %v519_v10, %v517_v9  ;;  %v524_v23 = vmul.f32 %v515_v18, %v492_v15 }
 0x126   : > { %v567_v54 = vsub.s32 %v564_v51, %v566_v52 }
 0x127   : > { %v534_v20 = vadd.f32 %v520_v14, %v518_v13  ;;  %v526_v22 = vadd.f32 %v525_v17, %v521_v16 }
 0x129   : > { %v535_v24 = vadd.f32 %v534_v20, %v522_v19  ;;  %v527_v25 = vadd.f32 %v526_v22, %v523_v21 }
 0x12b   : > { %v536_v26 = vadd.f32 %v535_v24, %v524_v23  ;;  %v528_v27 = vrot.slane %v527_v25, 4 }
 0x12d   : > { %v537_v28 = vrot.slane %v536_v26, 4  ;;  %v529_v29 = vadd.f32 %v528_v27, %v527_v25 }
 0x12f   : > { %v538_v30 = vadd.f32 %v537_v28, %v536_v26  ;;  %v530_v31 = vrot.slane %v529_v29, 2 }
 0x131   : > { %v539_v32 = vrot.slane %v538_v30, 2  ;;  %v531_v33 = vadd.f32 %v530_v31, %v529_v29 }
 0x133   : > { %v540_v34 = vadd.f32 %v539_v32, %v538_v30  ;;  %v532_v35 = vrot.slane %v531_v33, 1 }
 0x135   : > { %v541_v37 = vrot.slane %v540_v34, 1  ;;  %v533_v38 = vadd.f32 %v532_v35, %v531_v33 }
 0x137   : > { %v542_v39 = vadd.f32 %v541_v37, %v540_v34  ;;  %v545_v40 = vadd.f32 %v544_v36, %v533_v38 }
 0x139   : > { %v546_v41 = vadd.f32 %v544_v36, %v542_v39  ;;  %v699_v42 = vmul.f32 -1.442695, %v545_v40 }
 0x13b   : > { %v700_v43 = vmul.f32 -1.442695, %v546_v41  ;;  %822 = vpow2.f32 %v699_v42 }
 0x13d   : > { %824 = vpow2.f32 %v700_v43 }
 0x148   : > { %v823_v44 = vpop.eup %822 }
 0x149   : > { %v553_v46 = vadd.f32 1.0, %v823_v44 }
 0x14a   : > { %v825_v45 = vpop.eup %824 }
 0x14b   : > { %v554_v47 = vadd.f32 1.0, %v825_v45  ;;  %826 = vrcp.f32 %v553_v46 }
 0x14d   : > { %828 = vrcp.f32 %v554_v47 }
 0x158   : > { %v827_v53 = vpop.eup %826 }
 0x15a   : > { %v829_v55 = vpop.eup %828 }
 0x15b   : > { %v561_v56 = vcombine.low %v827_v53, %v829_v55 }
 0x15d   : > { %v568_v57 = vrot.slane %v561_v56, %v567_v54 }
 0x15f   : > { %v575_v58 = vrot.slane %v568_v57, %v567_v54 }
 0x161   : > { %581 = vst.msk [vmem:[%s219_s26] sm:$0x3] %vm579_vm1, %v575_v58 }
 0x162   : > { %843 = shalt.err (!%p840_p3)
}
 0x163   : > { %s844_s15 = scalar_lea.hbm %s595_s9, 32  ;;  %s848_s17 = scalar_lea.hbm %s1169_s5, 64 }
 0x164   : > { %p845_p4 = scmp.ne.s32.totalorder %s595_s9, %s844_s15  ;;  %p849_p9 = scmp.lt.s32.totalorder %s595_s9, %s1169_s5 }
 0x165   : > { %p850_p10 = scmp.lt.s32.totalorder %s848_s17, %s844_s15 }
 0x166   : > { %p846_p7 = pnand %p845_p4, %p963_p5 }
 0x167   : > { %p851_p11 = por %p850_p10, %p849_p9 }
 0x168   : > { %p847_p8 = pneg %p846_p7 }
 0x16a   : > { %p852_p12 = pnand %p851_p11, %p847_p8 }
 0x16c   : > { %855 = shalt.err (!%p852_p12)
}
 0x16d   : > { %779 = dma.vmem_to_hbm [thread:$0]  (%p963_p5), %s598_s27, 32, %s595_s9, %s583_s10  }
 0x16e PF: > { %p785_p13 = scmp.ge.s32.totalorder %s890_s23, 2  ;;  %s609_s4 = sand.u32 1, %s878_s20  }
 0x16f   : > { %s610_s24 = scalar_lea.sflag [#allocation4], %s609_s4 }
 0x170   : > { %p782_p0 = pnand %p785_p13, %p967_p6 }
 0x172   : > { %p783_p1 = pneg %p782_p0 }
 0x174   : > { %873 = dma.done.wait (%p783_p1), %s610_s24, 32  }
 0x175   : > { %875 = vsyncadd (%p783_p1), %s610_s24, 4294967264  ;;  %p16_p2 = scmp.ge.s32.totalorder %s951_s25, 4   ;;  %s1172_s20 = smov %s882_s21 }
 0x176   : > { %s1173_s21 = smov %s886_s22  ;;  %s1174_s22 = smov %s961_s28 }
 0x177   : > { %s1175_s23 = smov %s951_s25  ;;  %18 = sbr.rel (!%p16_p2) target bundleno = 5 (0x5), region = 75 }
 0x17c   :  { %615 = vsyncpa [#allocation4], 1 }
 0x17d   :  { %617 = vsyncpa [#allocation4 + $0x1], 1 }

</bundles_post_ra>
